<compile_context>
chip_gen: v7x
topology: tpu7x:2x2x1
jax: 0.10.0
libtpu: 0.0.40
codegen_flags: <defaults>
</compile_context>

<pallas_src>
import functools

import jax
import jax.numpy as jnp
from jax.experimental import pallas as pl
from jax.experimental.pallas import tpu as pltpu


# ---------------- small helpers ----------------
def _round_up(n, m):
    return ((n + m - 1) // m) * m


def _pick_tile(n, cap):
    """Largest tile <= cap that divides n and is a multiple of 128, else n itself."""
    t = cap
    while t >= 128:
        if n % t == 0:
            return t
        t //= 2
    return n


def _vmem_bytes(shape, itemsize):
    """Rough VMEM footprint with (sublane, lane) layout padding."""
    sub = {4: 8, 2: 16, 1: 32}[itemsize]
    lead = 1
    for d in shape[:-2]:
        lead *= d
    return lead * _round_up(shape[-2], sub) * _round_up(shape[-1], 128) * itemsize


def _tpu_flavor():
    """(bf16-logit math ok, attention row-tile cap, vmem budget cap)."""
    try:
        kind = jax.devices()[0].device_kind.lower()
    except Exception:  # pragma: no cover
        kind = ""
    logits_bf16 = ("v6" in kind) or ("v7" in kind)     # bf16-native VPU
    big_vmem = ("v5" in kind) or ("v6" in kind)        # 128 MiB VMEM parts
    tq_cap = 256 if big_vmem else 128                  # v7x/unknown: stay small
    vmem_cap = (100 if big_vmem else 56) * 1024 * 1024
    return logits_bf16, tq_cap, vmem_cap


# ---------- Kernel 1: post_attn1 (claim-gated linear) fused with conv1 projection ----------
def _postattn1_proj_kernel(x_ref, claim_ref, wp_ref, wc_ref, wcat_ref, o_ref):
    # TODO(synk): PostLevelAttention source is not in the reference file; assumed
    # semantics are sigmoid(claim @ Wc) * (post @ Wp) with bias-free gates.
    xb = x_ref[...].astype(jnp.bfloat16)
    cb = claim_ref[...].astype(jnp.bfloat16)
    post = jnp.dot(xb, wp_ref[...], preferred_element_type=jnp.float32)
    gate = jax.nn.sigmoid(jnp.dot(cb, wc_ref[...], preferred_element_type=jnp.float32))
    h = (gate * post).astype(jnp.bfloat16)
    # fused GATv2 projection: one matmul against [W_l | W_r] over all heads
    o_ref[...] = jnp.dot(h, wcat_ref[...],
                         preferred_element_type=jnp.float32).astype(o_ref.dtype)


# ---------- Kernel 2: post_attn2 (block-diag Wp, shared gate) fused with conv2 projection ----------
def _postattn2_proj_kernel(h_ref, claim_ref, wpblk_ref, wcrep_ref, wcat_ref, o_ref):
    # Block-diagonal Wp realizes the K per-slice linears as ONE matmul; the tiled
    # Wc makes the (shared) claim gate come out at full K*out width directly.
    hb = h_ref[...].astype(jnp.bfloat16)
    cb = claim_ref[...].astype(jnp.bfloat16)
    post = jnp.dot(hb, wpblk_ref[...], preferred_element_type=jnp.float32)
    gate = jax.nn.sigmoid(jnp.dot(cb, wcrep_ref[...], preferred_element_type=jnp.float32))
    h = (gate * post).astype(jnp.bfloat16)
    o_ref[...] = jnp.dot(h, wcat_ref[...],
                         preferred_element_type=jnp.float32).astype(o_ref.dtype)


# ---------- Kernel 3: dense GATv2 attention (target rows tiled, sources lane-dense) ----------
def _gatv2_attn_kernel(xl_ref, xlT_ref, xr_ref, mask_ref, att_ref, bias_ref,
                       o_ref, e_scr, *, sub_w, compute_dtype):
    heads, n_src, c = xl_ref.shape
    tq = xr_ref.shape[1]
    mask = mask_ref[...] > 0                                          # (TQ, N_src) bool
    neg = jnp.float32(-1e30)
    cdt = compute_dtype

    outs = []
    for h in range(heads):
        xl_h = xl_ref[h]                                              # (N_src, c)  bf16
        xlT_h = xlT_ref[h]                                            # (c, N_src)  bf16
        xr_h = xr_ref[h]                                              # (TQ, c)     bf16

        # e = sum_ch a[ch] * LeakyReLU_0.2(xr[:,ch] + xl[:,ch]^T)
        # LeakyReLU_0.2(s) == 0.6*s + 0.4*|s|; the linear 0.6*s part collapses to
        # per-row / per-column weighted sums hoisted out of the per-channel loop.
        lin_col = jnp.zeros((tq, 1), jnp.float32)
        lin_row = jnp.zeros((1, n_src), jnp.float32)
        for ch in range(c):
            a = att_ref[h, ch]
            lin_col = lin_col + a * xr_h[:, ch:ch + 1]
            lin_row = lin_row + a * xlT_h[ch:ch + 1, :]
        lin_col = 0.6 * lin_col
        lin_row = 0.6 * lin_row

        # Per-channel |.| accumulation, source axis sub-tiled so the accumulator
        # stays in registers; each logit sub-tile is written to VMEM scratch ONCE.
        xr_c = xr_h.astype(cdt)
        xlT_c = xlT_h.astype(cdt)
        a04 = [(att_ref[h, ch] * 0.4).astype(cdt) for ch in range(c)]
        for t in range(n_src // sub_w):
            lo = t * sub_w
            xlT_sub = xlT_c[:, lo:lo + sub_w]
            acc = jnp.zeros((tq, sub_w), cdt)
            for ch in range(c):
                s = xr_c[:, ch:ch + 1] + xlT_sub[ch:ch + 1, :]
                acc = acc + a04[ch] * jnp.abs(s)
            e_scr[:, lo:lo + sub_w] = (lin_col + lin_row[:, lo:lo + sub_w]
                                       + acc.astype(jnp.float32))

        # masked softmax over sources (f32); exp of masked entries underflows to
        # exact 0, so no second select; fully-masked rows zeroed via per-row flag.
        e = jnp.where(mask, e_scr[...], neg)
        m = jnp.max(e, axis=1, keepdims=True)
        p = jnp.exp(e - m)
        inv = pl.reciprocal(jnp.sum(p, axis=1, keepdims=True), approx=True)
        inv = jnp.where(m > jnp.float32(-5e29), inv, 0.0)
        # normalize AFTER the aggregation matmul (O(TQ*c) instead of O(TQ*N) work)
        outs.append(jnp.dot(p.astype(jnp.bfloat16), xl_h,
                            preferred_element_type=jnp.float32) * inv)

    out = jnp.concatenate(outs, axis=-1)                              # (TQ, heads*c)
    o_ref[...] = jnp.maximum(out + bias_ref[...], 0.0)                # fused bias + ReLU


# ---------- Kernel 4: claim readout + scatter_mean + concat + classifier + log_softmax ----------
def _readout_kernel(h_ref, hc_ref, mn_ref, fcw_ref, fcb_ref, clfw_ref, clfb_ref,
                    o_ref, shat_acc, s_acc):
    @pl.when(pl.program_id(0) == 0)
    def _():
        shat_acc[...] = jnp.zeros_like(shat_acc)
        s_acc[...] = jnp.zeros_like(s_acc)

    x = h_ref[...]
    hc = hc_ref[...]
    # torch concat order: (h_c, x, prod, diff) -> one 4*f2-wide contraction
    joint = jnp.concatenate([hc, x, x * hc, jnp.abs(hc - x)], axis=-1)
    z = jnp.dot(joint.astype(jnp.bfloat16), fcw_ref[...],
                preferred_element_type=jnp.float32) + fcb_ref[...]
    t = jnp.tanh(z)
    m = jnp.max(t, axis=-1, keepdims=True)
    p = jnp.exp(t - m)
    beta = p / jnp.sum(p, axis=-1, keepdims=True)                     # softmax over features
    s_hat = (beta * x).astype(jnp.bfloat16)

    mnb = mn_ref[...]                                                 # (B, TQ) bf16 mean weights
    shat_acc[...] += jnp.dot(mnb, s_hat, preferred_element_type=jnp.float32)
    s_acc[...] += jnp.dot(mnb, x.astype(jnp.bfloat16), preferred_element_type=jnp.float32)

    @pl.when(pl.program_id(0) == pl.num_programs(0) - 1)
    def _():
        s = jnp.concatenate([shat_acc[...], s_acc[...]], axis=-1)     # (B, 2*f2)
        logits = jnp.dot(s, clfw_ref[...], preferred_element_type=jnp.float32) + clfb_ref[...]
        mm = jnp.max(logits, axis=-1, keepdims=True)
        lse = mm + jnp.log(jnp.sum(jnp.exp(logits - mm), axis=-1, keepdims=True))
        o_ref[...] = logits - lse


# ---------------- pallas_call wrappers ----------------
def _rowwise_call(kernel, row_inputs, full_inputs, out_dim, out_dtype=jnp.float32,
                  tile_cap=512):
    n = row_inputs[0].shape[0]
    tq = _pick_tile(n, tile_cap)
    in_specs = ([pl.BlockSpec((tq, a.shape[1]), lambda i: (i, 0)) for a in row_inputs]
                + [pl.BlockSpec(a.shape, lambda i: (0, 0)) for a in full_inputs])
    return pl.pallas_call(
        kernel,
        grid=(n // tq,),
        out_shape=jax.ShapeDtypeStruct((n, out_dim), out_dtype),
        in_specs=in_specs,
        out_specs=pl.BlockSpec((tq, out_dim), lambda i: (i, 0)),
        compiler_params=pltpu.CompilerParams(dimension_semantics=("parallel",)),
    )(*row_inputs, *full_inputs)


def gatv2_attention(xl, xlT, xr, mask, att, bias):
    """xl/xr: (heads, N, c) bf16; xlT: (heads, c, N) bf16; mask: (N, N) int8."""
    heads, n_pad, c = xl.shape
    hc = heads * c
    logits_bf16, tq_cap, vmem_cap = _tpu_flavor()
    tq = _pick_tile(n_pad, tq_cap)
    sub_w = _pick_tile(n_pad, 512)
    cdt = jnp.bfloat16 if logits_bf16 else jnp.float32

    # explicit VMEM budget: resident src slabs + double-buffered tiles + scratch
    est = (_vmem_bytes((heads, n_pad, c), 2) + _vmem_bytes((heads, c, n_pad), 2)
           + 2 * (_vmem_bytes((heads, tq, c), 2) + _vmem_bytes((tq, n_pad), 1)
                  + _vmem_bytes((tq, hc), 4))
           + _vmem_bytes((tq, n_pad), 4) + _vmem_bytes((1, hc), 4))
    cp = dict(dimension_semantics=("parallel",))
    if est > 28 * 1024 * 1024:
        cp["vmem_limit_bytes"] = int(min(est + est // 2, vmem_cap))

    return pl.pallas_call(
        functools.partial(_gatv2_attn_kernel, sub_w=sub_w, compute_dtype=cdt),
        grid=(n_pad // tq,),
        out_shape=jax.ShapeDtypeStruct((n_pad, hc), jnp.float32),
        in_specs=[
            pl.BlockSpec((heads, n_pad, c), lambda i: (0, 0, 0)),    # source lin_l (resident)
            pl.BlockSpec((heads, c, n_pad), lambda i: (0, 0, 0)),    # source lin_l, transposed
            pl.BlockSpec((heads, tq, c), lambda i: (0, i, 0)),       # target lin_r row tile
            pl.BlockSpec((tq, n_pad), lambda i: (i, 0)),             # int8 adjacency mask tile
            pl.BlockSpec(memory_space=pltpu.MemorySpace.SMEM),       # attention scalars (heads, c)
            pl.BlockSpec((1, hc), lambda i: (0, 0)),                 # bias
        ],
        out_specs=pl.BlockSpec((tq, hc), lambda i: (i, 0)),
        scratch_shapes=[pltpu.VMEM((tq, n_pad), jnp.float32)],       # logit scratch
        compiler_params=pltpu.CompilerParams(**cp),
    )(xl, xlT, xr, mask, att, bias)


def claim_readout(h, h_c, mn, fc_w, fc_b, clf_w, clf_b):
    n, f2 = h.shape
    b = mn.shape[0]
    ncls = clf_w.shape[1]
    tq = _pick_tile(n, 512)
    # TODO(synk): on v7x this single-axis reduction runs on one TensorCore; it is a
    # negligible fraction of runtime so it is intentionally left serial.
    return pl.pallas_call(
        _readout_kernel,
        grid=(n // tq,),
        out_shape=jax.ShapeDtypeStruct((b, ncls), jnp.float32),
        in_specs=[
            pl.BlockSpec((tq, f2), lambda i: (i, 0)),
            pl.BlockSpec((tq, f2), lambda i: (i, 0)),
            pl.BlockSpec((b, tq), lambda i: (0, i)),
            pl.BlockSpec(fc_w.shape, lambda i: (0, 0)),
            pl.BlockSpec(fc_b.shape, lambda i: (0, 0)),
            pl.BlockSpec(clf_w.shape, lambda i: (0, 0)),
            pl.BlockSpec(clf_b.shape, lambda i: (0, 0)),
        ],
        out_specs=pl.BlockSpec((b, ncls), lambda i: (0, 0)),
        scratch_shapes=[pltpu.VMEM((b, f2), jnp.float32),
                        pltpu.VMEM((b, f2), jnp.float32)],
        compiler_params=pltpu.CompilerParams(dimension_semantics=("arbitrary",)),
    )(h, h_c, mn, fc_w, fc_b, clf_w, clf_b)


# ---------------- weight / layout plumbing (wrapper-side, one-time) ----------------
def _fuse_gat_weights(wl, wr):
    """(heads, f_in, c) x2 -> (f_in, 2*heads*c) concatenated projection weight."""
    heads, f_in, c = wl.shape
    wl_f = jnp.transpose(wl, (1, 0, 2)).reshape(f_in, heads * c)
    wr_f = jnp.transpose(wr, (1, 0, 2)).reshape(f_in, heads * c)
    return jnp.concatenate([wl_f, wr_f], axis=1)


def _split_heads(proj, heads, c):
    """(N, 2*heads*c) bf16 -> per-head slabs (heads,N,c), (heads,c,N), (heads,N,c)."""
    n = proj.shape[0]
    hc = heads * c
    lin_l = proj[:, :hc].reshape(n, heads, c)
    lin_r = proj[:, hc:].reshape(n, heads, c)
    xl = jnp.transpose(lin_l, (1, 0, 2))
    xlT = jnp.transpose(lin_l, (1, 2, 0))
    xr = jnp.transpose(lin_r, (1, 0, 2))
    return xl, xlT, xr


# ---------------- parameter construction (deterministic, synthetic) ----------------
def init_params(key, in_feats=16, pa1_out=32, heads1=2, c1=16, K=2,
                pa2_out=16, heads2=2, c2=16, n_classes=4):
    hidden1 = heads1 * c1
    slice_len = hidden1 // K
    conv2_in = K * pa2_out
    f2 = heads2 * c2
    ks = jax.random.split(key, 16)

    def w(k, shape):
        return jax.random.normal(k, shape, jnp.float32) * 0.1

    return dict(
        K=K,
        pa1_w_post=w(ks[0], (in_feats, pa1_out)),
        pa1_w_claim=w(ks[1], (in_feats, pa1_out)),
        c1_wl=w(ks[2], (heads1, pa1_out, c1)),
        c1_wr=w(ks[3], (heads1, pa1_out, c1)),
        c1_att=w(ks[4], (heads1, 1, c1)),
        c1_b=w(ks[5], (heads1 * c1,)),
        pa2_w_post=w(ks[6], (slice_len, pa2_out)),
        pa2_w_claim=w(ks[7], (in_feats, pa2_out)),
        c2_wl=w(ks[8], (heads2, conv2_in, c2)),
        c2_wr=w(ks[9], (heads2, conv2_in, c2)),
        c2_att=w(ks[10], (heads2, 1, c2)),
        c2_b=w(ks[11], (heads2 * c2,)),
        fc_w=w(ks[12], (4 * f2, f2)),      # fc input concat order: (h_c, x, prod, diff)
        fc_b=w(ks[13], (1, f2)),
        clf_w=w(ks[14], (2 * f2, n_classes)),
        clf_b=w(ks[15], (1, n_classes)),
    )


# ---------------- full forward (glue in JAX, hot paths in Pallas) ----------------
def chgat_forward(params, x, edge_index, bu_edge_index, root, batch, ptr,
                  skip_layer_2=False, layer_1_no_self_loops=False,
                  layer_2_no_self_loops=False):
    # TODO(synk): skip_layer_2 is consumed inside GATv2Conv_Autograd_Fn whose source
    # is not provided; accepted here but only the default (False) path is implemented.
    # TODO(synk): for graphs beyond ~8-16k nodes the dense int8 adjacency / dense mean
    # matrix should be replaced by a CSR gather with PrefetchScalarGridSpec.
    n, f_in = x.shape
    x = x.astype(jnp.float32)
    root = root.astype(jnp.float32)
    bf16 = jnp.bfloat16

    # pad node axis to a sublane/lane-friendly size; padded rows are fully masked
    # and carry zero weight in the per-graph mean, so they never propagate.
    n_pad = _round_up(n, 8) if n <= 128 else _round_up(n, 128)
    pad = n_pad - n
    x_p = jnp.pad(x, ((0, pad), (0, 0))) if pad else x
    batch_p = jnp.pad(batch, (0, pad), constant_values=-1) if pad else batch
    batch_c = jnp.clip(batch_p, 0, None)

    # root_extend == the explicit per-batch loop in the torch forward (raw root feats)
    root_extend = root[batch_c]                                       # (n_pad, f_in)

    # merged (TD + BU) edges -> dense int8 adjacency mask[target, source]
    src = jnp.concatenate([edge_index[0], bu_edge_index[0]])
    dst = jnp.concatenate([edge_index[1], bu_edge_index[1]])
    adj = jnp.zeros((n_pad, n_pad), jnp.int8).at[dst, src].set(1)
    self_idx = jnp.arange(n)
    adj_sl = adj.at[self_idx, self_idx].set(1)                        # self loops: real nodes only
    mask1 = adj if layer_1_no_self_loops else adj_sl
    mask2 = adj if layer_2_no_self_loops else adj_sl

    heads1, _, c1 = params["c1_wl"].shape
    heads2, _, c2 = params["c2_wl"].shape

    # ---- layer 1: post_attn1 fused with conv1's [lin_l | lin_r] projection ----
    wcat1 = _fuse_gat_weights(params["c1_wl"], params["c1_wr"]).astype(bf16)
    proj1 = _rowwise_call(
        _postattn1_proj_kernel, [x_p, root_extend],
        [params["pa1_w_post"].astype(bf16), params["pa1_w_claim"].astype(bf16), wcat1],
        wcat1.shape[1], out_dtype=bf16)
    xl1, xlT1, xr1 = _split_heads(proj1, heads1, c1)
    h1 = gatv2_attention(xl1, xlT1, xr1, mask1,
                         params["c1_att"].reshape(heads1, c1),
                         params["c1_b"].reshape(1, -1))               # (n_pad, H1*C1), ReLU fused

    # ---- layer 2: post_attn2 (block-diag Wp, shared gate) fused with conv2 projection ----
    K = params["K"]
    pa2_out = params["pa2_w_post"].shape[1]
    slice_len = params["pa2_w_post"].shape[0]
    hidden1 = heads1 * c1
    wp_blk = jnp.zeros((hidden1, K * pa2_out), jnp.float32)
    for k in range(K):
        wp_blk = wp_blk.at[k * slice_len:(k + 1) * slice_len,
                           k * pa2_out:(k + 1) * pa2_out].set(params["pa2_w_post"])
    wc_rep = jnp.tile(params["pa2_w_claim"], (1, K))
    wcat2 = _fuse_gat_weights(params["c2_wl"], params["c2_wr"]).astype(bf16)
    proj2 = _rowwise_call(
        _postattn2_proj_kernel, [h1, root_extend],
        [wp_blk.astype(bf16), wc_rep.astype(bf16), wcat2],
        wcat2.shape[1], out_dtype=bf16)
    xl2, xlT2, xr2 = _split_heads(proj2, heads2, c2)
    h2 = gatv2_attention(xl2, xlT2, xr2, mask2,
                         params["c2_att"].reshape(heads2, c2),
                         params["c2_b"].reshape(1, -1))               # (n_pad, H2*C2), ReLU fused

    # ---- claim-aware readout + scatter_mean + classifier + log_softmax (one kernel) ----
    n_graphs = ptr.shape[0] - 1
    h_c = h2[ptr[:-1]][batch_c]                                       # per-node root embedding
    onehot = (batch_p[None, :] == jnp.arange(n_graphs)[:, None]).astype(jnp.float32)
    mn = (onehot / jnp.maximum(jnp.sum(onehot, axis=1, keepdims=True), 1.0)).astype(bf16)
    return claim_readout(h2, h_c, mn, params["fc_w"].astype(bf16), params["fc_b"],
                         params["clf_w"], params["clf_b"])


if __name__ == "__main__":
    key = jax.random.PRNGKey(0)
    kp, kx = jax.random.split(key, 2)
    params = init_params(kp)

    # two small rumor trees: graph0 = nodes 0..4, graph1 = nodes 5..7
    x = jax.random.normal(kx, (8, 16), jnp.float32)
    batch = jnp.array([0, 0, 0, 0, 0, 1, 1, 1], jnp.int32)
    ptr = jnp.array([0, 5, 8], jnp.int32)
    rootindex = jnp.array([0, 5], jnp.int32)
    root = x[rootindex]                                               # (B, 16) root-claim features
    edge_index = jnp.array([[0, 0, 1, 1, 5, 5],
                            [1, 2, 3, 4, 6, 7]], jnp.int32)           # top-down edges
    bu_edge_index = edge_index[::-1]                                  # bottom-up (reversed) edges

    out = chgat_forward(params, x, edge_index, bu_edge_index, root, batch, ptr)
    out = jax.block_until_ready(out)
    assert out.shape == (2, 4)
    assert bool(jnp.all(jnp.isfinite(out)))
    print("KERNEL_OK")
</pallas_src>

<mosaic_0001>
module attributes {stable_mosaic.version = 11 : i64} {
  func.func @_postattn1_proj_kernel(%arg0: i32, %arg1: memref<8x16xf32, #tpu.memory_space<vmem>>, %arg2: memref<8x16xf32, #tpu.memory_space<vmem>>, %arg3: memref<16x32xbf16, #tpu.memory_space<vmem>>, %arg4: memref<16x32xbf16, #tpu.memory_space<vmem>>, %arg5: memref<32x64xbf16, #tpu.memory_space<vmem>>, %arg6: memref<8x64xbf16, #tpu.memory_space<vmem>>) attributes {dimension_semantics = [#tpu.dimension_semantics<parallel>], iteration_bounds = array<i64: 1>, scalar_prefetch = 0 : i64, scratch_operands = 0 : i64, tpu.core_type = #tpu.core_type<tc>, window_params = [{transform_indices = @transform_0, window_bounds = array<i64: 8, 16>}, {transform_indices = @transform_1, window_bounds = array<i64: 8, 16>}, {pipeline_mode = #tpu.pipeline_mode<synchronous>, transform_indices = @transform_2, window_bounds = array<i64: 16, 32>}, {pipeline_mode = #tpu.pipeline_mode<synchronous>, transform_indices = @transform_3, window_bounds = array<i64: 16, 32>}, {pipeline_mode = #tpu.pipeline_mode<synchronous>, transform_indices = @transform_4, window_bounds = array<i64: 32, 64>}, {transform_indices = @transform_5, window_bounds = array<i64: 8, 64>}]} {
    %c0 = arith.constant 0 : index
    %c0_0 = arith.constant 0 : index
    %0 = vector.load %arg1[%c0, %c0_0] : memref<8x16xf32, #tpu.memory_space<vmem>>, vector<8x16xf32>
    %1 = arith.truncf %0 : vector<8x16xf32> to vector<8x16xbf16>
    %c0_1 = arith.constant 0 : index
    %c0_2 = arith.constant 0 : index
    %2 = vector.load %arg2[%c0_1, %c0_2] : memref<8x16xf32, #tpu.memory_space<vmem>>, vector<8x16xf32>
    %3 = arith.truncf %2 : vector<8x16xf32> to vector<8x16xbf16>
    %c0_3 = arith.constant 0 : index
    %c0_4 = arith.constant 0 : index
    %4 = vector.load %arg3[%c0_3, %c0_4] : memref<16x32xbf16, #tpu.memory_space<vmem>>, vector<16x32xbf16>
    %cst = arith.constant dense<0.000000e+00> : vector<8x32xf32>
    %5 = tpu.matmul %1, %4, %cst {dimension_numbers = #tpu.dot_dimension_numbers<[1], [0], [0], [1], [0, 0, 1, 1], [], []>} : vector<8x16xbf16>, vector<16x32xbf16>, vector<8x32xf32> -> vector<8x32xf32>
    %c0_5 = arith.constant 0 : index
    %c0_6 = arith.constant 0 : index
    %6 = vector.load %arg4[%c0_5, %c0_6] : memref<16x32xbf16, #tpu.memory_space<vmem>>, vector<16x32xbf16>
    %cst_7 = arith.constant dense<0.000000e+00> : vector<8x32xf32>
    %7 = tpu.matmul %3, %6, %cst_7 {dimension_numbers = #tpu.dot_dimension_numbers<[1], [0], [0], [1], [0, 0, 1, 1], [], []>} : vector<8x16xbf16>, vector<16x32xbf16>, vector<8x32xf32> -> vector<8x32xf32>
    %8 = arith.negf %7 : vector<8x32xf32>
    %9 = math.exp %8 : vector<8x32xf32>
    %cst_8 = arith.constant 1.000000e+00 : f32
    %10 = vector.broadcast %cst_8 : f32 to vector<8x32xf32>
    %11 = arith.addf %10, %9 : vector<8x32xf32>
    %12 = arith.divf %10, %11 : vector<8x32xf32>
    %13 = arith.mulf %12, %5 : vector<8x32xf32>
    %14 = arith.truncf %13 : vector<8x32xf32> to vector<8x32xbf16>
    %c0_9 = arith.constant 0 : index
    %c0_10 = arith.constant 0 : index
    %15 = vector.load %arg5[%c0_9, %c0_10] : memref<32x64xbf16, #tpu.memory_space<vmem>>, vector<32x64xbf16>
    %cst_11 = arith.constant dense<0.000000e+00> : vector<8x64xf32>
    %16 = tpu.matmul %14, %15, %cst_11 {dimension_numbers = #tpu.dot_dimension_numbers<[1], [0], [0], [1], [0, 0, 1, 1], [], []>} : vector<8x32xbf16>, vector<32x64xbf16>, vector<8x64xf32> -> vector<8x64xf32>
    %17 = arith.truncf %16 : vector<8x64xf32> to vector<8x64xbf16>
    %c0_12 = arith.constant 0 : index
    %c0_13 = arith.constant 0 : index
    %18 = vector.load %arg6[%c0_12, %c0_13] : memref<8x64xbf16, #tpu.memory_space<vmem>>, vector<8x64xbf16>
    tpu.vector_store %arg6[%c0_12, %c0_13], %17 {strides = array<i32>} : memref<8x64xbf16, #tpu.memory_space<vmem>>, vector<8x64xbf16>,
    return
  }
  func.func @transform_0(%arg0: i32) -> (i32, i32) {
    %c0_i32 = arith.constant 0 : i32
    %c0_i32_0 = arith.constant 0 : i32
    return %arg0, %c0_i32 : i32, i32
  }
  func.func @transform_1(%arg0: i32) -> (i32, i32) {
    %c0_i32 = arith.constant 0 : i32
    %c0_i32_0 = arith.constant 0 : i32
    return %arg0, %c0_i32 : i32, i32
  }
  func.func @transform_2(%arg0: i32) -> (i32, i32) {
    %c0_i32 = arith.constant 0 : i32
    %c0_i32_0 = arith.constant 0 : i32
    %c0_i32_1 = arith.constant 0 : i32
    return %c0_i32, %c0_i32_0 : i32, i32
  }
  func.func @transform_3(%arg0: i32) -> (i32, i32) {
    %c0_i32 = arith.constant 0 : i32
    %c0_i32_0 = arith.constant 0 : i32
    %c0_i32_1 = arith.constant 0 : i32
    return %c0_i32, %c0_i32_0 : i32, i32
  }
  func.func @transform_4(%arg0: i32) -> (i32, i32) {
    %c0_i32 = arith.constant 0 : i32
    %c0_i32_0 = arith.constant 0 : i32
    %c0_i32_1 = arith.constant 0 : i32
    return %c0_i32, %c0_i32_0 : i32, i32
  }
  func.func @transform_5(%arg0: i32) -> (i32, i32) {
    %c0_i32 = arith.constant 0 : i32
    %c0_i32_0 = arith.constant 0 : i32
    return %arg0, %c0_i32 : i32, i32
  }
}

</mosaic_0001>

<bundles_post_ra>
// kernel: tpu_custom_call.1
= control target key start
LH: loop header
LB: loop body
LE: loop exit
PB: predicated region body
PF: predicated region fallthrough
CT: control target
= control target key end

     0   :  { %10 = vsyncpa [#allocation3], 0  ;;  %s543_s0 = inlined_call_operand.hbm [shape: f32[8,16], index: 0, kind: input, shape index: {}]   ;;  %s544_s1 = inlined_call_operand.hbm [shape: f32[8,16], index: 1, kind: input, shape index: {}]   ;;  %s545_s2 = inlined_call_operand.hbm [shape: bf16[16,32], index: 2, kind: input, shape index: {}]   ;;  %s546_s3 = inlined_call_operand.vmem [shape: bf16[16,32], index: 3, kind: input, shape index: {}]   ;;  %s547_s4 = inlined_call_operand.hbm [shape: bf16[32,64], index: 4, kind: input, shape index: {}]   ;;  %s548_s5 = inlined_call_operand.hbm [shape: bf16[8,64], index: 5, kind: output, shape index: {}]  }
   0x1   :  { %11 = vsyncpa [#allocation6], 0 }
   0x2   :  { %12 = vsyncpa [#allocation9], 0 }
   0x3   :  { %13 = vsyncpa [#allocation4], 0  ;;  %s438_s18 = smov [#allocation5]   ;;  %s439_s20 = smov [#allocation2]  }
   0x4   :  { %s30_s19 = sshll.u32 %s438_s18, 4  ;;  %s20_s21 = sshll.u32 %s439_s20, 4  ;;  %s31_s19 = int_to_ptr.vmem [resolvable:$true] %s30_s19  ;;  %s21_s21 = int_to_ptr.vmem [resolvable:$true] %s20_s21 }
   0x5   :  { %s320_s24 = scalar_lea.hbm %s544_s1, 128 }
   0x6   :  { %p321_p0 = scmp.ne.s32.totalorder %s544_s1, %s320_s24  ;;  %p324_p1 = scmp.lt.u32.totalorder %s320_s24, %s544_s1 }
   0x8   :  { %p326_p2 = pnand %p324_p1, %p321_p0 }
   0xa   :  { %329 = shalt.err (!%p326_p2)
}
   0xb   :  { %s330_s29 = scalar_lea.vmem %s31_s19, 128  ;;  %p335_p4 = scmp.lt.s32.totalorder %s31_s19, %s31_s19 }
   0xc   :  { %p331_p3 = scmp.ne.s32.totalorder %s31_s19, %s330_s29  ;;  %p336_p5 = scmp.lt.s32.totalorder %s330_s29, %s330_s29 }
   0xe   :  { %p337_p6 = por %p336_p5, %p335_p4 }
  0x10   :  { %p338_p7 = pnand %p337_p6, %p331_p3 }
  0x12   :  { %341 = shalt.err (!%p338_p7)
}
  0x13   :  { %33 = dma.hbm_to_vmem [thread:$0]  %s544_s1, 128, %s31_s19, [#allocation6]  }
  0x14   :  { %s342_s9 = scalar_lea.hbm %s543_s0, 128 }
  0x15   :  { %p343_p8 = scmp.ne.s32.totalorder %s543_s0, %s342_s9  ;;  %p346_p9 = scmp.lt.u32.totalorder %s342_s9, %s543_s0 }
  0x17   :  { %p348_p10 = pnand %p346_p9, %p343_p8 }
  0x19   :  { %351 = shalt.err (!%p348_p10)
}
  0x1a   :  { %s352_s14 = scalar_lea.vmem %s21_s21, 128  ;;  %p357_p12 = scmp.lt.s32.totalorder %s21_s21, %s21_s21 }
  0x1b   :  { %p353_p11 = scmp.ne.s32.totalorder %s21_s21, %s352_s14  ;;  %p358_p13 = scmp.lt.s32.totalorder %s352_s14, %s352_s14 }
  0x1d   :  { %p359_p0 = por %p358_p13, %p357_p12 }
  0x1f   :  { %p360_p1 = pnand %p359_p0, %p353_p11 }
  0x21   :  { %363 = shalt.err (!%p360_p1)
}
  0x22   :  { %23 = dma.hbm_to_vmem [thread:$0]  %s543_s0, 128, %s21_s21, [#allocation3]  }
  0x23   :  { %s440_s16 = smov [#allocation7]   ;;  %s364_s20 = scalar_lea.hbm %s545_s2, 128 }
  0x24   :  { %s39_s17 = sshll.u32 %s440_s16, 4  ;;  %p365_p2 = scmp.ne.s32.totalorder %s545_s2, %s364_s20  ;;  %s40_s17 = int_to_ptr.vmem [resolvable:$true] %s39_s17 }
  0x25   :  { %p368_p3 = scmp.lt.u32.totalorder %s364_s20, %s545_s2 }
  0x27   :  { %p370_p4 = pnand %p368_p3, %p365_p2 }
  0x29   :  { %373 = shalt.err (!%p370_p4)
}
  0x2a   :  { %s374_s26 = scalar_lea.vmem %s40_s17, 128  ;;  %p379_p6 = scmp.lt.s32.totalorder %s40_s17, %s40_s17 }
  0x2b   :  { %p375_p5 = scmp.ne.s32.totalorder %s40_s17, %s374_s26  ;;  %p380_p7 = scmp.lt.s32.totalorder %s374_s26, %s374_s26 }
  0x2d   :  { %p381_p8 = por %p380_p7, %p379_p6 }
  0x2f   :  { %p382_p9 = pnand %p381_p8, %p375_p5 }
  0x31   :  { %385 = shalt.err (!%p382_p9)
}
  0x32   :  { %s441_s0 = smov 64   ;;  %s442_s21 = smov 4  }
  0x33   :  { %45 = dma.hbm_to_vmem [thread:$0]  %s545_s2, 128, %s40_s17, [#allocation6], %s441_s0, %s441_s0, %s442_s21  }
  0x34   :  { %s443_s29 = smov [#allocation8]   ;;  %s386_s8 = scalar_lea.hbm %s547_s4, 256 }
  0x35   :  { %s53_s30 = sshll.u32 %s443_s29, 4  ;;  %p387_p10 = scmp.ne.s32.totalorder %s547_s4, %s386_s8  ;;  %s54_s30 = int_to_ptr.vmem [resolvable:$true] %s53_s30 }
  0x36   :  { %p390_p11 = scmp.lt.u32.totalorder %s386_s8, %s547_s4 }
  0x38   :  { %p392_p12 = pnand %p390_p11, %p387_p10 }
  0x3a   :  { %395 = shalt.err (!%p392_p12)
}
  0x3b   :  { %s396_s13 = scalar_lea.vmem %s54_s30, 256  ;;  %p401_p0 = scmp.lt.s32.totalorder %s54_s30, %s54_s30 }
  0x3c   :  { %p397_p13 = scmp.ne.s32.totalorder %s54_s30, %s396_s13  ;;  %p402_p1 = scmp.lt.s32.totalorder %s396_s13, %s396_s13 }
  0x3e   :  { %p403_p2 = por %p402_p1, %p401_p0 }
  0x40   :  { %p404_p3 = pnand %p403_p2, %p397_p13 }
  0x42   :  { %407 = shalt.err (!%p404_p3)
}
  0x43   :  { %59 = dma.hbm_to_vmem [thread:$0]  %s547_s4, 256, %s54_s30, [#allocation9], %s441_s0, %s441_s0, %s442_s21  }
  0x44   :  { %430 = dma.done.wait [#allocation3], 128  }
  0x45   :  { %431 = vsyncadd [#allocation3], 4294967168 }
  0x46   :  { %432 = dma.done.wait [#allocation6], 256  }
  0x47   :  { %433 = vsyncadd [#allocation6], 4294967040 }
  0x48   :  { %434 = dma.done.wait [#allocation9], 256  }
  0x49   :  { %435 = vsyncadd [#allocation9], 4294967040  ;;  %v444_v0 = vmov 0.0   ;;  %vm445_vm0 = vmmov 0   ;;  %v312_v1 = vld [vmem:[%s546_s3] sm:$0xff]   ;;  %v75_v2 = vld [vmem:[#allocation5] sm:$0xff] }
  0x4a   :  { %289 = vmatprep.subr.bf16.mxu1 %v444_v0  ;;  %291 = vmatprep.mubr.msk.bf16.mxu1 %vm445_vm0, %v444_v0  ;;  %v76_v3 = vpack.c.bf16 %v75_v2, %v75_v2  ;;  %vm85_vm1 = vcmask 130048   ;;  %v313_v4 = vld [vmem:[#allocation7] sm:$0xff]   ;;  %v73_v5 = vld [vmem:[#allocation2] sm:$0xff]  ;;  %v314_v7 = vld [vmem:[#allocation8] sm:$0xff]   ;;  %vm204_vm2 = vcmask 261120   ;;  %s446_s3 = smov [#allocation10]  }
  0x4b   :  { %283 = vmatprep.subr.bf16.mxu0 %v444_v0  ;;  %285 = vmatprep.mubr.msk.bf16.mxu0 %vm445_vm0, %v444_v0  ;;  %v74_v6 = vpack.c.bf16 %v73_v5, %v73_v5  ;;  %v315_v8 = vld [vmem:[#allocation8 + $0x8] sm:$0xff]   ;;  %s257_s4 = sshll.u32 %s446_s3, 4  ;;  %vm249_vm3 = vcmask 519168   ;;  %s258_s4 = int_to_ptr.vmem [resolvable:$true] %s257_s4 }
  0x4c   :  { %290 = vmatpush3.bf16.msra.mxu1 %v312_v1  ;;  %284 = vmatpush3.bf16.msra.mxu0 %v313_v4  ;;  %s408_s16 = scalar_lea.vmem %s258_s4, 64  ;;  %p413_p5 = scmp.lt.s32.totalorder %s258_s4, %s258_s4 }
  0x4d   :  { %295 = vmatprep.subr.bf16.mxu0 %v444_v0  ;;  %p409_p4 = scmp.ne.s32.totalorder %s258_s4, %s408_s16  ;;  %p414_p6 = scmp.lt.s32.totalorder %s408_s16, %s408_s16 }
  0x4f   :  { %292 = vmatmul.mubr.msk.bf16.vlgmr.msra.gmra.mrb[0].mxu1 %vm85_vm1, %v76_v3  ;;  %286 = vmatmul.mubr.msk.bf16.vlgmr.msra.gmra.mrb[0].mxu0 %vm85_vm1, %v74_v6  ;;  %p415_p7 = por %p414_p6, %p413_p5 }
  0x50   :  { %299 = vmatprep.mubr.msk.bf16.mxu0 %vm445_vm0, %v444_v0  ;;  %296 = vmatpush3.bf16.msra.mxu0 %v314_v7 }
  0x51   :  { %297 = vmatprep.subr.bf16.mxu0 %v444_v0  ;;  %p416_p8 = pnand %p415_p7, %p409_p4 }
  0x54   :  { %298 = vmatpush3.bf16.msra.mxu0 %v315_v8 }
 0x122   :  { %v174_v9 = vpop.f32.mrb[0].mxu1  ;;  %v123_v13 = vpop.f32.mrb[0].mxu0 }
 0x123   :  { %v272_v10 = vmul.f32 -1.442695, %v174_v9  ;;  %v293_v11 = vpop.f32.mrb[1].mxu1  ;;  %v287_v15 = vpop.f32.mrb[1].mxu0 }
 0x124   :  { %v177_v12 = vpop.f32.mrb[2].mxu1  ;;  %v126_v16 = vpop.f32.mrb[2].mxu0 }
 0x125   :  { %316 = vpow2.f32 %v272_v10  ;;  %v294_v14 = vpop.f32.mrb[3].mxu1  ;;  %v288_v17 = vpop.f32.mrb[3].mxu0 }
 0x12f   :  { %v317_v18 = vpop.eup %316 }
 0x130   :  { %v183_v19 = vadd.f32 1.0, %v317_v18 }
 0x132   :  { %318 = vrcp.f32 %v183_v19 }
 0x13c   :  { %v319_v20 = vpop.eup %318 }
 0x13d   :  { %v186_v21 = vmul.f32 %v319_v20, %v123_v13 }
 0x13f   :  { %v187_v22 = vpack.c.bf16 %v186_v21, %v186_v21 }
 0x141   :  { %300 = vmatmul.mubr.msk.bf16.vlgmr.msra.gmra.mrb[4].mxu0 %vm204_vm2, %v187_v22 }
 0x214   :  { %v242_v23 = vpop.f32.mrb[4].mxu0 }
 0x215   :  { %v248_v24 = vpack.c.bf16 %v242_v23, %v242_v23  ;;  %v301_v25 = vpop.f32.mrb[5].mxu0 }
 0x216   :  { %v245_v26 = vpop.f32.mrb[6].mxu0 }
 0x217   :  { %v302_v27 = vpop.f32.mrb[7].mxu0  ;;  %250 = vst.msk [vmem:[#allocation10] sm:$0xf] %vm249_vm3, %v248_v24 }
 0x218   :  { %419 = shalt.err (!%p416_p8)
}
 0x219   :  { %s420_s19 = scalar_lea.hbm %s548_s5, 64 }
 0x21a   :  { %p421_p9 = scmp.ne.s32.totalorder %s548_s5, %s420_s19  ;;  %p424_p10 = scmp.lt.u32.totalorder %s420_s19, %s548_s5 }
 0x21c   :  { %p426_p11 = pnand %p424_p10, %p421_p9 }
 0x21e   :  { %429 = shalt.err (!%p426_p11)
}
 0x21f   :  { %260 = dma.vmem_to_hbm [thread:$0]  %s258_s4, 64, %s548_s5, [#allocation4]  }
 0x220   :  { %436 = dma.done.wait [#allocation4], 64  }
 0x221   :  { %437 = vsyncadd [#allocation4], 4294967232 }
 0x222   :  { %264 = vsyncpa [#allocation3], 1 }
 0x223   :  { %265 = vsyncpa [#allocation6], 1 }
 0x224   :  { %266 = vsyncpa [#allocation9], 1 }
 0x225   :  { %267 = vsyncpa [#allocation4], 1 }

</bundles_post_ra>
